<compile_context>
chip_gen: v5e
topology: v5e:2x2
jax: 0.10.0
libtpu: 0.0.40
codegen_flags: <defaults>
</compile_context>

<pallas_src>
import jax
import jax.numpy as jnp
from jax.experimental import pallas as pl
from jax.experimental.pallas import tpu as pltpu

# ---- problem sizes (small, consistent with the module) ---------------------
BATCH = 10          # forward concatenates q_out[0..9] -> 10 rows
IN_FEATURES = 512   # pre_net input
BS_SIZE = 16        # bs_size (pre_net output)
EMB_SIZE = 32       # bs.embedding_size (surrogate)
HIDDEN = 128        # linear output
N_CLASSES = 10      # post_net output

# ---- padded (lane-dense) feature size ---------------------------------------
N_PAD = 128         # all feature dims padded to one full lane tile


def dressed_kernel(x_ref, w1_ref, w2_ref, b_ref, o_ref):
    """Fused forward: out = tanh(x @ W1 + b1) @ W2 + b2 (f32, lane-dense)."""
    # matmul 1: [10, 512] f32 @ [512, 128] f32 -> f32
    h = jnp.dot(x_ref[...], w1_ref[...],
                preferred_element_type=jnp.float32) + b_ref[0:1, :]
    h = jnp.tanh(h)                                   # f32 tanh (v5e-safe)
    # matmul 2: [10, 128] f32 @ [128, 128] f32 -> f32
    o_ref[...] = jnp.dot(h, w2_ref[...],
                         preferred_element_type=jnp.float32) + b_ref[1:2, :]


def dressed_quantum_net(x, padded_params):
    """x: [BATCH, 512] float32 -> [BATCH, N_CLASSES] float32."""
    w1, w2, b = padded_params
    m = x.shape[0]

    flops = 2 * m * IN_FEATURES * N_PAD + 2 * m * N_PAD * N_PAD
    bytes_accessed = 4 * (x.size + w1.size + w2.size + b.size + m * N_PAD)

    vmem = pl.BlockSpec(memory_space=pltpu.MemorySpace.VMEM)
    out_pad = pl.pallas_call(
        dressed_kernel,
        out_shape=jax.ShapeDtypeStruct((m, N_PAD), jnp.float32),
        in_specs=[vmem] * 4,
        out_specs=vmem,
        cost_estimate=pl.CostEstimate(
            flops=flops,
            transcendentals=m * N_PAD,
            bytes_accessed=bytes_accessed),
    )(x, w1, w2, b)

    # Lane-dense 128-wide kernel output; only the real 10 classes are returned.
    return out_pad[:, :N_CLASSES]


def init_params(key):
    """Deterministic init, mimicking PyTorch Linear default (U[-1/sqrt(fan_in), +])."""
    ks = jax.random.split(key, 7)

    def lin(kw, kb, fan_in, fan_out):
        bound = 1.0 / jnp.sqrt(fan_in)
        w = jax.random.uniform(kw, (fan_in, fan_out), jnp.float32, -bound, bound)
        b = jax.random.uniform(kb, (fan_out,), jnp.float32, -bound, bound)
        return w, b

    w_pre, b_pre = lin(ks[0], ks[1], IN_FEATURES, BS_SIZE)
    # surrogate embedding projection (stands in for bs.embed)
    w_emb = jax.random.uniform(ks[2], (BS_SIZE, EMB_SIZE), jnp.float32, -0.5, 0.5)
    w_lin, b_lin = lin(ks[3], ks[4], EMB_SIZE, HIDDEN)
    w_post, b_post = lin(ks[5], ks[6], HIDDEN, N_CLASSES)
    return (w_pre, b_pre, w_emb, w_lin, b_lin, w_post, b_post)


def compose_and_pad_params(params):
    """Host-side, one-time: precompose linear chains + pad to lane-dense f32 tiles."""
    (w_pre, b_pre, w_emb, w_lin, b_lin, w_post, b_post) = params

    # Exact algebraic precomposition (no nonlinearity between the fused pairs).
    w1 = w_pre @ w_emb                         # [512, 32]
    b1 = b_pre @ w_emb                         # [32]
    w2 = w_lin @ w_post                        # [32, 10]
    b2 = b_lin @ w_post + b_post               # [10]

    # Zero-pad feature dims to 128 lanes; keep everything f32 (accuracy is free
    # here — the kernel is launch-overhead-bound).
    w1_pad = jnp.zeros((IN_FEATURES, N_PAD), jnp.float32).at[:, :EMB_SIZE].set(w1)
    w2_pad = jnp.zeros((N_PAD, N_PAD), jnp.float32).at[:EMB_SIZE, :N_CLASSES].set(w2)
    # Pack both biases into one [2, 128] array: row 0 = b1, row 1 = b2.
    b_pad = (jnp.zeros((2, N_PAD), jnp.float32)
             .at[0, :EMB_SIZE].set(b1)
             .at[1, :N_CLASSES].set(b2))

    return (w1_pad, w2_pad, b_pad)


if __name__ == "__main__":
    key = jax.random.PRNGKey(0)
    k_x, k_p = jax.random.split(key)
    x = jax.random.normal(k_x, (BATCH, IN_FEATURES), jnp.float32)
    params = init_params(k_p)
    padded_params = compose_and_pad_params(params)

    fwd = jax.jit(dressed_quantum_net)
    out = fwd(x, padded_params)
    jax.block_until_ready(out)
    assert out.shape == (BATCH, N_CLASSES)

    # --- reference 1: same composed f32 math in plain JAX (tight) ---
    w1, w2, b = padded_params
    h_ref = jnp.tanh(x @ w1 + b[0:1, :])
    ref1 = (h_ref @ w2 + b[1:2, :])[:, :N_CLASSES]
    assert jnp.allclose(out, ref1, atol=1e-4, rtol=1e-4)

    # --- reference 2: original un-composed f32 layer chain ---
    (w_pre, b_pre, w_emb, w_lin, b_lin, w_post, b_post) = params
    ref2 = jnp.tanh((x @ w_pre + b_pre) @ w_emb) @ w_lin + b_lin
    ref2 = ref2 @ w_post + b_post
    assert jnp.allclose(out, ref2, atol=1e-3, rtol=1e-3)

    print("KERNEL_OK")
</pallas_src>

<mosaic_0001>
module attributes {stable_mosaic.version = 11 : i64} {
  func.func @dressed_kernel(%arg0: memref<10x512xf32, #tpu.memory_space<vmem>>, %arg1: memref<512x128xf32, #tpu.memory_space<vmem>>, %arg2: memref<128x128xf32, #tpu.memory_space<vmem>>, %arg3: memref<2x128xf32, #tpu.memory_space<vmem>>, %arg4: memref<10x128xf32, #tpu.memory_space<vmem>>) attributes {dimension_semantics = [], scalar_prefetch = 0 : i64, scratch_operands = 0 : i64, tpu.core_type = #tpu.core_type<tc>} {
    %c0 = arith.constant 0 : index
    %c0_0 = arith.constant 0 : index
    %0 = vector.load %arg0[%c0, %c0_0] : memref<10x512xf32, #tpu.memory_space<vmem>>, vector<10x512xf32>
    %c0_1 = arith.constant 0 : index
    %c0_2 = arith.constant 0 : index
    %1 = vector.load %arg1[%c0_1, %c0_2] : memref<512x128xf32, #tpu.memory_space<vmem>>, vector<512x128xf32>
    %cst = arith.constant dense<0.000000e+00> : vector<10x128xf32>
    %2 = tpu.matmul %0, %1, %cst {dimension_numbers = #tpu.dot_dimension_numbers<[1], [0], [0], [1], [0, 0, 1, 1], [], []>} : vector<10x512xf32>, vector<512x128xf32>, vector<10x128xf32> -> vector<10x128xf32>
    %c0_3 = arith.constant 0 : index
    %c0_4 = arith.constant 0 : index
    %3 = vector.load %arg3[%c0_3, %c0_4] : memref<2x128xf32, #tpu.memory_space<vmem>>, vector<1x128xf32>
    %4 = vector.broadcast %3 : vector<1x128xf32> to vector<10x128xf32>
    %5 = arith.addf %2, %4 : vector<10x128xf32>
    %6 = math.tanh %5 : vector<10x128xf32>
    %c0_5 = arith.constant 0 : index
    %c0_6 = arith.constant 0 : index
    %7 = vector.load %arg2[%c0_5, %c0_6] : memref<128x128xf32, #tpu.memory_space<vmem>>, vector<128x128xf32>
    %cst_7 = arith.constant dense<0.000000e+00> : vector<10x128xf32>
    %8 = tpu.matmul %6, %7, %cst_7 {dimension_numbers = #tpu.dot_dimension_numbers<[1], [0], [0], [1], [0, 0, 1, 1], [], []>} : vector<10x128xf32>, vector<128x128xf32>, vector<10x128xf32> -> vector<10x128xf32>
    %c1 = arith.constant 1 : index
    %c0_8 = arith.constant 0 : index
    %9 = vector.load %arg3[%c1, %c0_8] : memref<2x128xf32, #tpu.memory_space<vmem>>, vector<1x128xf32>
    %10 = vector.broadcast %9 : vector<1x128xf32> to vector<10x128xf32>
    %11 = arith.addf %8, %10 : vector<10x128xf32>
    %c0_9 = arith.constant 0 : index
    %c0_10 = arith.constant 0 : index
    %12 = vector.load %arg4[%c0_9, %c0_10] : memref<10x128xf32, #tpu.memory_space<vmem>>, vector<10x128xf32>
    tpu.vector_store %arg4[%c0_9, %c0_10], %11 {strides = array<i32>} : memref<10x128xf32, #tpu.memory_space<vmem>>, vector<10x128xf32>,
    return
  }
}

</mosaic_0001>

<bundles_post_ra>
// kernel: dressed_quantum_net.1
= control target key start
LH: loop header
LB: loop body
LE: loop exit
PB: predicated region body
PF: predicated region fallthrough
CT: control target
= control target key end

     0   :  { %9 = vsyncpa [#allocation3], 0  ;;  %s488_s0 = inlined_call_operand.hbm [shape: f32[10,512], index: 0, kind: input, shape index: {}]   ;;  %s489_s1 = inlined_call_operand.hbm [shape: f32[512,128], index: 1, kind: input, shape index: {}]   ;;  %s490_s2 = inlined_call_operand.hbm [shape: f32[128,128], index: 2, kind: input, shape index: {}]   ;;  %s491_s3 = inlined_call_operand.vmem [shape: f32[2,128], index: 3, kind: input, shape index: {}]   ;;  %s492_s4 = inlined_call_operand.hbm [shape: f32[10,128], index: 4, kind: output, shape index: {}]  }
   0x1   :  { %10 = vsyncpa [#allocation6], 0  ;;  %s29_s17 = sshll.u32 %s489_s1, 4  ;;  %s30_s17 = int_to_ptr.hbm [resolvable:$true] %s29_s17 }
   0x2   :  { %11 = vsyncpa [#allocation4], 0  ;;  %s428_s18 = smov [#allocation5]   ;;  %s16_s22 = sshll.u32 %s488_s0, 4  ;;  %s17_s22 = int_to_ptr.hbm [resolvable:$true] %s16_s22 }
   0x3   :  { %s31_s19 = sshll.u32 %s428_s18, 4  ;;  %s429_s23 = smov 128   ;;  %s32_s19 = int_to_ptr.vmem [resolvable:$true] %s31_s19 }
   0x4   :  { %s430_s24 = smov 8   ;;  %s431_s25 = smov [#allocation2]  }
   0x5   :  { %37 = dma.hbm_to_vmem [thread:$0]  %s30_s17, 8192, %s32_s19, [#allocation6], %s429_s23, %s429_s23, %s430_s24  }
   0x6   :  { %s18_s26 = sshll.u32 %s431_s25, 4  ;;  %s432_s1 = smov 512   ;;  %s19_s26 = int_to_ptr.vmem [resolvable:$true] %s18_s26 }
   0x7   :  { %s433_s27 = smov 32   ;;  %s42_s30 = sshll.u32 %s490_s2, 4  ;;  %s43_s30 = int_to_ptr.hbm [resolvable:$true] %s42_s30 }
   0x8   :  { %24 = dma.hbm_to_vmem [thread:$0]  %s17_s22, 1024, %s19_s26, [#allocation3], %s432_s1, %s432_s1, %s433_s27  }
   0x9   :  { %s434_s5 = smov [#allocation7]  }
   0xa   :  { %s44_s0 = sshll.u32 %s434_s5, 4  ;;  %s45_s0 = int_to_ptr.vmem [resolvable:$true] %s44_s0 }
   0xb   :  { %50 = dma.hbm_to_vmem [thread:$0]  %s43_s30, 2048, %s45_s0, [#allocation6], %s429_s23, %s429_s23, %s430_s24  }
   0xc   :  { %422 = dma.done.wait [#allocation3], 1024  }
   0xd   :  { %423 = vsyncadd [#allocation3], 4294966272 }
   0xe   :  { %424 = dma.done.wait [#allocation6], 10240  }
   0xf   :  { %425 = vsyncadd [#allocation6], 4294957056  ;;  %v120_v0 = vld [vmem:[#allocation5 + $0x178] sm:$0xff]  ;;  %v119_v2 = vld [vmem:[#allocation5 + $0x170] sm:$0xff]  ;;  %s435_s9 = smov [#allocation8]   ;;  %s282_s13 = sshll.u32 %s492_s4, 4  ;;  %s283_s13 = int_to_ptr.hbm [resolvable:$true] %s282_s13 }
  0x10   :  { %v88_v1 = vld [vmem:[#allocation5 + $0x78] sm:$0xff]  ;;  %185 = vmatpush.msra.mxu2 %v120_v0  ;;  %v87_v4 = vld [vmem:[#allocation5 + $0x70] sm:$0xff]  ;;  %v118_v6 = vld [vmem:[#allocation5 + $0x168] sm:$0xff]  ;;  %s280_s10 = sshll.u32 %s435_s9, 4  ;;  %s281_s10 = int_to_ptr.vmem [resolvable:$true] %s280_s10 }
  0x11   :  { %139 = vmatpush.msra.mxu0 %v88_v1  ;;  %v136_v3 = vld [vmem:[#allocation5 + $0x1f8] sm:$0xff]  ;;  %v135_v7 = vld [vmem:[#allocation5 + $0x1f0] sm:$0xff]  ;;  %v86_v8 = vld [vmem:[#allocation5 + $0x68] sm:$0xff] }
  0x12   :  { %v104_v5 = vld [vmem:[#allocation5 + $0xf8] sm:$0xff]  ;;  %208 = vmatpush.msra.mxu3 %v136_v3  ;;  %186 = vmatpush.msra.mxu2 %v119_v2  ;;  %v103_v9 = vld [vmem:[#allocation5 + $0xf0] sm:$0xff]  ;;  %v134_v10 = vld [vmem:[#allocation5 + $0x1e8] sm:$0xff] }
  0x13   :  { %162 = vmatpush.msra.mxu1 %v104_v5  ;;  %140 = vmatpush.msra.mxu0 %v87_v4  ;;  %v117_v11 = vld [vmem:[#allocation5 + $0x160] sm:$0xff]  ;;  %v102_v13 = vld [vmem:[#allocation5 + $0xe8] sm:$0xff]  ;;  %v116_v16 = vld [vmem:[#allocation5 + $0x158] sm:$0xff] }
  0x14   :  { %209 = vmatpush.msra.mxu3 %v135_v7  ;;  %v85_v12 = vld [vmem:[#allocation5 + $0x60] sm:$0xff]  ;;  %187 = vmatpush.msra.mxu2 %v118_v6  ;;  %v84_v17 = vld [vmem:[#allocation5 + $0x58] sm:$0xff]  ;;  %v115_v20 = vld [vmem:[#allocation5 + $0x150] sm:$0xff] }
  0x15   :  { %163 = vmatpush.msra.mxu1 %v103_v9  ;;  %141 = vmatpush.msra.mxu0 %v86_v8  ;;  %v133_v14 = vld [vmem:[#allocation5 + $0x1e0] sm:$0xff]  ;;  %v132_v18 = vld [vmem:[#allocation5 + $0x1d8] sm:$0xff]  ;;  %v83_v21 = vld [vmem:[#allocation5 + $0x50] sm:$0xff] }
  0x16   :  { %v101_v15 = vld [vmem:[#allocation5 + $0xe0] sm:$0xff]  ;;  %210 = vmatpush.msra.mxu3 %v134_v10  ;;  %188 = vmatpush.msra.mxu2 %v117_v11  ;;  %v100_v19 = vld [vmem:[#allocation5 + $0xd8] sm:$0xff]  ;;  %v131_v22 = vld [vmem:[#allocation5 + $0x1d0] sm:$0xff] }
  0x17   :  { %164 = vmatpush.msra.mxu1 %v102_v13  ;;  %142 = vmatpush.msra.mxu0 %v85_v12  ;;  %v99_v23 = vld [vmem:[#allocation5 + $0xd0] sm:$0xff]  ;;  %v114_v24 = vld [vmem:[#allocation5 + $0x148] sm:$0xff]  ;;  %v113_v28 = vld [vmem:[#allocation5 + $0x140] sm:$0xff] }
  0x18   :  { %211 = vmatpush.msra.mxu3 %v133_v14  ;;  %189 = vmatpush.msra.mxu2 %v116_v16  ;;  %v82_v25 = vld [vmem:[#allocation5 + $0x48] sm:$0xff]  ;;  %v81_v29 = vld [vmem:[#allocation5 + $0x40] sm:$0xff]  ;;  %v112_v32 = vld [vmem:[#allocation5 + $0x138] sm:$0xff] }
  0x19   :  { %165 = vmatpush.msra.mxu1 %v101_v15  ;;  %143 = vmatpush.msra.mxu0 %v84_v17  ;;  %v130_v26 = vld [vmem:[#allocation5 + $0x1c8] sm:$0xff]  ;;  %v129_v30 = vld [vmem:[#allocation5 + $0x1c0] sm:$0xff]  ;;  %v80_v33 = vld [vmem:[#allocation5 + $0x38] sm:$0xff] }
  0x1a   :  { %212 = vmatpush.msra.mxu3 %v132_v18  ;;  %190 = vmatpush.msra.mxu2 %v115_v20  ;;  %v98_v27 = vld [vmem:[#allocation5 + $0xc8] sm:$0xff]  ;;  %v97_v31 = vld [vmem:[#allocation5 + $0xc0] sm:$0xff]  ;;  %v128_v34 = vld [vmem:[#allocation5 + $0x1b8] sm:$0xff] }
  0x1b   :  { %166 = vmatpush.msra.mxu1 %v100_v19  ;;  %144 = vmatpush.msra.mxu0 %v83_v21  ;;  %v96_v35 = vld [vmem:[#allocation5 + $0xb8] sm:$0xff]  ;;  %v111_v36 = vld [vmem:[#allocation5 + $0x130] sm:$0xff]  ;;  %v110_v40 = vld [vmem:[#allocation5 + $0x128] sm:$0xff] }
  0x1c   :  { %213 = vmatpush.msra.mxu3 %v131_v22  ;;  %191 = vmatpush.msra.mxu2 %v114_v24  ;;  %v79_v37 = vld [vmem:[#allocation5 + $0x30] sm:$0xff]  ;;  %v78_v41 = vld [vmem:[#allocation5 + $0x28] sm:$0xff]  ;;  %v109_v44 = vld [vmem:[#allocation5 + $0x120] sm:$0xff] }
  0x1d   :  { %167 = vmatpush.msra.mxu1 %v99_v23  ;;  %145 = vmatpush.msra.mxu0 %v82_v25  ;;  %v127_v38 = vld [vmem:[#allocation5 + $0x1b0] sm:$0xff]  ;;  %v126_v42 = vld [vmem:[#allocation5 + $0x1a8] sm:$0xff]  ;;  %v77_v45 = vld [vmem:[#allocation5 + $0x20] sm:$0xff] }
  0x1e   :  { %214 = vmatpush.msra.mxu3 %v130_v26  ;;  %192 = vmatpush.msra.mxu2 %v113_v28  ;;  %v95_v39 = vld [vmem:[#allocation5 + $0xb0] sm:$0xff]  ;;  %v94_v43 = vld [vmem:[#allocation5 + $0xa8] sm:$0xff]  ;;  %v125_v46 = vld [vmem:[#allocation5 + $0x1a0] sm:$0xff] }
  0x1f   :  { %168 = vmatpush.msra.mxu1 %v98_v27  ;;  %146 = vmatpush.msra.mxu0 %v81_v29  ;;  %v93_v47 = vld [vmem:[#allocation5 + $0xa0] sm:$0xff]  ;;  %v108_v48 = vld [vmem:[#allocation5 + $0x118] sm:$0xff]  ;;  %v107_v52 = vld [vmem:[#allocation5 + $0x110] sm:$0xff] }
  0x20   :  { %215 = vmatpush.msra.mxu3 %v129_v30  ;;  %193 = vmatpush.msra.mxu2 %v112_v32  ;;  %v76_v49 = vld [vmem:[#allocation5 + $0x18] sm:$0xff]  ;;  %v75_v53 = vld [vmem:[#allocation5 + $0x10] sm:$0xff]  ;;  %v106_v56 = vld [vmem:[#allocation5 + $0x108] sm:$0xff] }
  0x21   :  { %169 = vmatpush.msra.mxu1 %v97_v31  ;;  %147 = vmatpush.msra.mxu0 %v80_v33  ;;  %v124_v50 = vld [vmem:[#allocation5 + $0x198] sm:$0xff]  ;;  %v123_v54 = vld [vmem:[#allocation5 + $0x190] sm:$0xff]  ;;  %v74_v57 = vld [vmem:[#allocation5 + $0x8] sm:$0xff] }
  0x22   :  { %216 = vmatpush.msra.mxu3 %v128_v34  ;;  %194 = vmatpush.msra.mxu2 %v111_v36  ;;  %v92_v51 = vld [vmem:[#allocation5 + $0x98] sm:$0xff]  ;;  %v91_v55 = vld [vmem:[#allocation5 + $0x90] sm:$0xff]  ;;  %v122_v58 = vld [vmem:[#allocation5 + $0x188] sm:$0xff] }
  0x23   :  { %170 = vmatpush.msra.mxu1 %v96_v35  ;;  %148 = vmatpush.msra.mxu0 %v79_v37  ;;  %v90_v59 = vld [vmem:[#allocation5 + $0x88] sm:$0xff]  ;;  %v105_v60 = vld [vmem:[#allocation5 + $0x100] sm:$0xff]  ;;  %v67_v62 = vld [vmem:[#allocation2 + $0x10] sm:$0xff] }
  0x24   :  { %217 = vmatpush.msra.mxu3 %v127_v38  ;;  %195 = vmatpush.msra.mxu2 %v110_v40  ;;  %v73_v61 = vld [vmem:[#allocation5] sm:$0xff]  ;;  %v68_v1 = vld [vmem:[#allocation2 + $0x18] sm:$0xff]  ;;  %v66_v4 = vld [vmem:[#allocation2 + $0x8] sm:$0xff] }
  0x25   :  { %171 = vmatpush.msra.mxu1 %v95_v39  ;;  %149 = vmatpush.msra.mxu0 %v78_v41  ;;  %v121_v63 = vld [vmem:[#allocation5 + $0x180] sm:$0xff]  ;;  %v248_v3 = vld [vmem:[#allocation7 + $0x78] sm:$0xff]  ;;  %v247_v5 = vld [vmem:[#allocation7 + $0x70] sm:$0xff] }
  0x26   :  { %218 = vmatpush.msra.mxu3 %v126_v42  ;;  %196 = vmatpush.msra.mxu2 %v109_v44  ;;  %v65_v0 = vld [vmem:[#allocation2] sm:$0xff]  ;;  %v246_v6 = vld [vmem:[#allocation7 + $0x68] sm:$0xff]  ;;  %v71_v7 = vld [vmem:[#allocation2 + $0x30] sm:$0x3] }
  0x27   :  { %172 = vmatpush.msra.mxu1 %v94_v43  ;;  %150 = vmatpush.msra.mxu0 %v77_v45  ;;  %v89_v2 = vld [vmem:[#allocation5 + $0x80] sm:$0xff]  ;;  %v72_v10 = vld [vmem:[#allocation2 + $0x38] sm:$0x3]  ;;  %v70_v12 = vld [vmem:[#allocation2 + $0x28] sm:$0x3] }
  0x28   :  { %219 = vmatpush.msra.mxu3 %v125_v46  ;;  %197 = vmatpush.msra.mxu2 %v108_v48  ;;  %v245_v8 = vld [vmem:[#allocation7 + $0x60] sm:$0xff]  ;;  %v244_v11 = vld [vmem:[#allocation7 + $0x58] sm:$0xff]  ;;  %v243_v13 = vld [vmem:[#allocation7 + $0x50] sm:$0xff] }
  0x29   :  { %173 = vmatpush.msra.mxu1 %v93_v47  ;;  %151 = vmatpush.msra.mxu0 %v76_v49  ;;  %v69_v9 = vld [vmem:[#allocation2 + $0x20] sm:$0x3]  ;;  %v242_v14 = vld [vmem:[#allocation7 + $0x48] sm:$0xff]  ;;  %v240_v16 = vld [vmem:[#allocation7 + $0x38] sm:$0xff] }
  0x2a   :  { %220 = vmatpush.msra.mxu3 %v124_v50  ;;  %198 = vmatpush.msra.mxu2 %v107_v52  ;;  %v241_v15 = vld [vmem:[#allocation7 + $0x40] sm:$0xff]  ;;  %v239_v17 = vld [vmem:[#allocation7 + $0x30] sm:$0xff]  ;;  %v238_v18 = vld [vmem:[#allocation7 + $0x28] sm:$0xff] }
  0x2b   :  { %174 = vmatpush.msra.mxu1 %v92_v51  ;;  %152 = vmatpush.msra.mxu0 %v75_v53  ;;  %v237_v19 = vld [vmem:[#allocation7 + $0x20] sm:$0xff]  ;;  %v236_v20 = vld [vmem:[#allocation7 + $0x18] sm:$0xff]  ;;  %v235_v21 = vld [vmem:[#allocation7 + $0x10] sm:$0xff] }
  0x2c   :  { %221 = vmatpush.msra.mxu3 %v123_v54  ;;  %199 = vmatpush.msra.mxu2 %v106_v56  ;;  %v234_v22 = vld [vmem:[#allocation7 + $0x8] sm:$0xff]  ;;  %v233_v23 = vld [vmem:[#allocation7] sm:$0xff] }
  0x2d   :  { %175 = vmatpush.msra.mxu1 %v91_v55  ;;  %153 = vmatpush.msra.mxu0 %v74_v57  ;;  %v320_v24 = vld [vmem:[%s491_s3] ss:$0 sm:$0xff]  ;;  %v321_v43 = vld [vmem:[%s491_s3 + $0x1] ss:$0 sm:$0xff] }
  0x2e   :  { %222 = vmatpush.msra.mxu3 %v122_v58  ;;  %200 = vmatpush.msra.mxu2 %v105_v60 }
  0x2f   :  { %176 = vmatpush.msra.mxu1 %v90_v59  ;;  %154 = vmatpush.msra.mxu0 %v73_v61 }
  0x30   :  { %201 = vmatmul.f32.vlgmr.msra.gmra.mxu2 %v67_v62  ;;  %223 = vmatpush.msra.mxu3 %v121_v63 }
  0x31   :  { %155 = vmatmul.f32.vlgmr.msra.gmra.mxu0 %v65_v0  ;;  %224 = vmatmul.f32.vlgmr.msra.gmra.mxu3 %v68_v1 }
  0x32   :  { %177 = vmatpush.msra.mxu1 %v89_v2  ;;  %251 = vmatpush.msrb.mxu0 %v248_v3 }
  0x33   :  { %178 = vmatmul.f32.vlgmr.msra.gmra.mxu1 %v66_v4 }
  0x34   :  { %252 = vmatpush.msrb.mxu0 %v247_v5  ;;  %296 = vmatpush.msrb.mxu1 %v248_v3 }
  0x36   :  { %253 = vmatpush.msrb.mxu0 %v246_v6  ;;  %297 = vmatpush.msrb.mxu1 %v247_v5 }
  0x38   :  { %204 = vmatmul.f32.gmra.mxu2 %v71_v7  ;;  %254 = vmatpush.msrb.mxu0 %v245_v8 }
  0x39   :  { %158 = vmatmul.f32.gmra.mxu0 %v69_v9  ;;  %227 = vmatmul.f32.gmra.mxu3 %v72_v10 }
  0x3a   :  { %255 = vmatpush.msrb.mxu0 %v244_v11  ;;  %298 = vmatpush.msrb.mxu1 %v246_v6 }
  0x3b   :  { %181 = vmatmul.f32.gmra.mxu1 %v70_v12 }
  0x3c   :  { %256 = vmatpush.msrb.mxu0 %v243_v13  ;;  %299 = vmatpush.msrb.mxu1 %v245_v8 }
  0x3e   :  { %257 = vmatpush.msrb.mxu0 %v242_v14  ;;  %300 = vmatpush.msrb.mxu1 %v244_v11 }
  0x40   :  { %258 = vmatpush.msrb.mxu0 %v241_v15  ;;  %301 = vmatpush.msrb.mxu1 %v243_v13 }
  0x42   :  { %302 = vmatpush.msrb.mxu1 %v242_v14  ;;  %259 = vmatpush.msrb.mxu0 %v240_v16 }
  0x44   :  { %303 = vmatpush.msrb.mxu1 %v241_v15  ;;  %260 = vmatpush.msrb.mxu0 %v239_v17 }
  0x46   :  { %304 = vmatpush.msrb.mxu1 %v240_v16  ;;  %261 = vmatpush.msrb.mxu0 %v238_v18 }
  0x48   :  { %305 = vmatpush.msrb.mxu1 %v239_v17  ;;  %262 = vmatpush.msrb.mxu0 %v237_v19 }
  0x4a   :  { %306 = vmatpush.msrb.mxu1 %v238_v18  ;;  %263 = vmatpush.msrb.mxu0 %v236_v20 }
  0x4c   :  { %307 = vmatpush.msrb.mxu1 %v237_v19  ;;  %264 = vmatpush.msrb.mxu0 %v235_v21 }
  0x4e   :  { %308 = vmatpush.msrb.mxu1 %v236_v20  ;;  %265 = vmatpush.msrb.mxu0 %v234_v22 }
  0x50   :  { %309 = vmatpush.msrb.mxu1 %v235_v21  ;;  %266 = vmatpush.msrb.mxu0 %v233_v23 }
  0x52   :  { %310 = vmatpush.msrb.mxu1 %v234_v22 }
  0x54   :  { %311 = vmatpush.msrb.mxu1 %v233_v23 }
  0xae   :  { %v156_v25 = vpop.f32.mrf.mxu0 }
  0xaf   :  { %v157_v26 = vadd.f32 %v320_v24, %v156_v25 }
  0xb0   :  { %v179_v27 = vpop.f32.mrf.mxu1 }
  0xb1   :  { %v180_v28 = vadd.f32 %v179_v27, %v157_v26 }
  0xb3   :  { %v202_v29 = vpop.f32.mrf.mxu2 }
  0xb4   :  { %v203_v30 = vadd.f32 %v202_v29, %v180_v28  ;;  %v225_v31 = vpop.f32.mrf.mxu3 }
  0xb6   :  { %v226_v32 = vadd.f32 %v225_v31, %v203_v30  ;;  %v159_v33 = vpop.f32.mrf.mxu0 }
  0xb7   :  { %v160_v34 = vadd.f32 %v320_v24, %v159_v33 }
  0xb8   :  { %322 = vtanh.f32 %v226_v32  ;;  %v182_v35 = vpop.f32.mrf.mxu1 }
  0xb9   :  { %v183_v36 = vadd.f32 %v182_v35, %v160_v34 }
  0xbb   :  { %v205_v37 = vpop.f32.mrf.mxu2 }
  0xbc   :  { %v206_v38 = vadd.f32 %v205_v37, %v183_v36  ;;  %v228_v39 = vpop.f32.mrf.mxu3 }
  0xbe   :  { %v323_v40 = vpop.eup %322  ;;  %v229_v41 = vadd.f32 %v228_v39, %v206_v38 }
  0xbf   :  { %267 = vmatmul.f32.vlgmr.msrb.gmra.mxu0 %v323_v40 }
  0xc0   :  { %324 = vtanh.f32 %v229_v41 }
  0xc6   :  { %v325_v42 = vpop.eup %324 }
  0xc7   :  { %270 = vmatmul.f32.vlgmr.msrb.gmra.mxu1 %v325_v42 }
 0x13c   :  { %v268_v44 = vpop.f32.mrf.mxu0 }
 0x13d   :  { %v269_v45 = vadd.f32 %v321_v43, %v268_v44 }
 0x13f   :  { %274 = vst [vmem:[#allocation8] sm:$0xff] %v269_v45 }
 0x144   :  { %v271_v46 = vpop.f32.mrf.mxu1 }
 0x145   :  { %v272_v47 = vadd.f32 %v321_v43, %v271_v46 }
 0x147   :  { %275 = vst [vmem:[#allocation8 + $0x8] sm:$0x3] %v272_v47 }
 0x148   :  { %288 = dma.vmem_to_hbm [thread:$0]  %s281_s10, 256, %s283_s13, [#allocation4], %s429_s23, %s429_s23, %s430_s24  }
 0x149   :  { %426 = dma.done.wait [#allocation4], 256  }
 0x14a   :  { %427 = vsyncadd [#allocation4], 4294967040 }
 0x14b   :  { %293 = vsyncpa [#allocation3], 1 }
 0x14c   :  { %294 = vsyncpa [#allocation6], 1 }
 0x14d   :  { %295 = vsyncpa [#allocation4], 1 }

</bundles_post_ra>
